<compile_context>
chip_gen: v7x
topology: tpu7x:2x2x1
jax: 0.10.0
libtpu: 0.0.40
codegen_flags: <defaults>
</compile_context>

<pallas_src>
import functools

import jax
import jax.numpy as jnp
from jax.experimental import pallas as pl
from jax.experimental.pallas import tpu as pltpu

# ----- model dimensions (from the PyTorch module) -----
DIM_S = 5
DIM_X = 4                # "dimX = dimX + 1" -> chosen base dimX = 3
DIM_IN = DIM_X + DIM_S   # 9
NUM_NEURON = 50
DIM_H2 = 10
DIM_OUT = 1


def _round_up(n: int, m: int) -> int:
    return ((n + m - 1) // m) * m


def _mlp_kernel(x_ref, w1_ref, b1_ref, w2_ref, b2_ref, w3t_ref, b3_ref, o_ref):
    """Fused 3-layer MLP: relu(fc1) -> relu(fc2) -> softplus(fc3).

    x_ref:   (bm, DIM_IN)        activations tile (bf16 or f32)
    w1_ref:  (DIM_IN, NUM_NEURON)   b1_ref: (1, NUM_NEURON)
    w2_ref:  (NUM_NEURON, DIM_H2)   b2_ref: (1, DIM_H2)
    w3t_ref: (DIM_OUT, DIM_H2)  (PyTorch (out,in) layout)   b3_ref: (1, DIM_OUT)
    o_ref:   (1, bm)             lane-dense output row (batch on lanes)
    """
    # Widen to f32 immediately (v5e VPU has no bf16 ALUs; MXU f32 is fine here).
    x = x_ref[...].astype(jnp.float32)

    # fc1 + ReLU : (bm, 9) @ (9, 50)
    h1 = jnp.dot(x, w1_ref[...], preferred_element_type=jnp.float32) + b1_ref[...]
    h1 = jnp.maximum(h1, 0.0)

    # fc2 + ReLU : (bm, 50) @ (50, 10)
    h2 = jnp.dot(h1, w2_ref[...], preferred_element_type=jnp.float32) + b2_ref[...]
    h2 = jnp.maximum(h2, 0.0)

    # fc3 : contract the 10 features of w3 (1, 10) against the minor dim of
    # h2 (bm, 10) -> (1, bm).  This puts the batch on the lane axis so the
    # store / HBM writeback is lane-dense instead of a 1-lane masked store.
    z = jax.lax.dot_general(
        w3t_ref[...], h2,
        dimension_numbers=(((1,), (1,)), ((), ())),
        preferred_element_type=jnp.float32,
    ) + b3_ref[...]

    # Numerically stable softplus: max(z, 0) + log1p(exp(-|z|))
    sp = jnp.maximum(z, 0.0) + jnp.log1p(jnp.exp(-jnp.abs(z)))
    o_ref[...] = sp.astype(o_ref.dtype)


@functools.partial(jax.jit, static_argnames=("block_m",))
def net_forward(x, w1, b1, w2, b2, w3t, b3, *, block_m=1024):
    """x: (B, DIM_IN) float (bf16 recommended: halves input DMA) -> (B, 1) f32."""
    B, din = x.shape
    assert din == DIM_IN

    # Effective batch tile: multiple of 128 (lane-dense output blocks), but no
    # larger than the (rounded-up) batch.  Default 1024 makes per-grid-step
    # pipeline overhead negligible; for v7x keep B/block_m >= ~8 when possible
    # so the grid can be balanced across both TensorCores.
    bm = max(128, min(_round_up(block_m, 128), _round_up(B, 128)))
    B_pad = _round_up(B, bm)
    if B_pad != B:
        x = jnp.pad(x, ((0, B_pad - B), (0, 0)))
    num_tiles = B_pad // bm

    out_row = pl.pallas_call(
        _mlp_kernel,
        out_shape=jax.ShapeDtypeStruct((1, B_pad), jnp.float32),
        grid=(num_tiles,),
        in_specs=[
            pl.BlockSpec((bm, DIM_IN), lambda i: (i, 0)),            # x (batch-tiled)
            pl.BlockSpec((DIM_IN, NUM_NEURON), lambda i: (0, 0)),    # w1 (resident)
            pl.BlockSpec((1, NUM_NEURON), lambda i: (0, 0)),         # b1
            pl.BlockSpec((NUM_NEURON, DIM_H2), lambda i: (0, 0)),    # w2
            pl.BlockSpec((1, DIM_H2), lambda i: (0, 0)),             # b2
            pl.BlockSpec((DIM_OUT, DIM_H2), lambda i: (0, 0)),       # w3 (out,in)
            pl.BlockSpec((1, DIM_OUT), lambda i: (0, 0)),            # b3
        ],
        out_specs=pl.BlockSpec((1, bm), lambda i: (0, i)),           # lane-dense row
        compiler_params=pltpu.CompilerParams(
            dimension_semantics=("parallel",)),
    )(x, w1, b1, w2, b2, w3t, b3)

    # (1, B_pad) -> (B, 1); padded rows are dropped.
    return out_row.reshape(B_pad, 1)[:B]


def init_params(key):
    """Deterministic synthetic parameters (PyTorch-like uniform fan-in init)."""
    ks = jax.random.split(key, 6)

    def linear(kw, kb, fan_in, fan_out, transpose=False):
        bound = 1.0 / (fan_in ** 0.5)
        shape = (fan_out, fan_in) if transpose else (fan_in, fan_out)
        w = jax.random.uniform(kw, shape, jnp.float32, -bound, bound)
        b = jax.random.uniform(kb, (1, fan_out), jnp.float32, -bound, bound)
        return w, b

    w1, b1 = linear(ks[0], ks[1], DIM_IN, NUM_NEURON)
    w2, b2 = linear(ks[2], ks[3], NUM_NEURON, DIM_H2)
    # fc3 weight kept in PyTorch (out, in) layout = (1, 10).
    w3t, b3 = linear(ks[4], ks[5], DIM_H2, DIM_OUT, transpose=True)
    return w1, b1, w2, b2, w3t, b3


def reference_forward(x, w1, b1, w2, b2, w3t, b3):
    x = x.astype(jnp.float32)
    h1 = jnp.maximum(x @ w1 + b1, 0.0)
    h2 = jnp.maximum(h1 @ w2 + b2, 0.0)
    z = h2 @ w3t.T + b3
    return jnp.maximum(z, 0.0) + jnp.log1p(jnp.exp(-jnp.abs(z)))


if __name__ == "__main__":
    key = jax.random.PRNGKey(0)
    k_x, k_p = jax.random.split(key)
    params = init_params(k_p)

    # Case 1: tiny batch (pads up to one 128-row tile), bf16 inputs.
    B1 = 16
    x1 = jax.random.normal(k_x, (B1, DIM_IN), jnp.float32).astype(jnp.bfloat16)
    out1 = jax.block_until_ready(net_forward(x1, *params))
    ref1 = reference_forward(x1, *params)
    assert out1.shape == (B1, DIM_OUT)
    assert jnp.allclose(out1, ref1, atol=1e-4, rtol=1e-4), "mismatch vs reference (B=16)"

    # Case 2: batch not divisible by the tile -> exercises padding + multi-tile grid.
    B2 = 300
    x2 = jax.random.normal(k_x, (B2, DIM_IN), jnp.float32).astype(jnp.bfloat16)
    out2 = jax.block_until_ready(net_forward(x2, *params, block_m=256))
    ref2 = reference_forward(x2, *params)
    assert out2.shape == (B2, DIM_OUT)
    assert jnp.allclose(out2, ref2, atol=1e-4, rtol=1e-4), "mismatch vs reference (B=300)"

    print("KERNEL_OK")
</pallas_src>

<mosaic_0001>
module attributes {stable_mosaic.version = 11 : i64} {
  func.func @_mlp_kernel(%arg0: i32, %arg1: memref<128x9xbf16, #tpu.memory_space<vmem>>, %arg2: memref<9x50xf32, #tpu.memory_space<vmem>>, %arg3: memref<1x50xf32, #tpu.memory_space<vmem>>, %arg4: memref<50x10xf32, #tpu.memory_space<vmem>>, %arg5: memref<1x10xf32, #tpu.memory_space<vmem>>, %arg6: memref<1x10xf32, #tpu.memory_space<vmem>>, %arg7: memref<1x1xf32, #tpu.memory_space<vmem>>, %arg8: memref<1x128xf32, #tpu.memory_space<vmem>>) attributes {dimension_semantics = [#tpu.dimension_semantics<parallel>], iteration_bounds = array<i64: 1>, scalar_prefetch = 0 : i64, scratch_operands = 0 : i64, tpu.core_type = #tpu.core_type<tc>, window_params = [{transform_indices = @transform_0, window_bounds = array<i64: 128, 9>}, {pipeline_mode = #tpu.pipeline_mode<synchronous>, transform_indices = @transform_1, window_bounds = array<i64: 9, 50>}, {pipeline_mode = #tpu.pipeline_mode<synchronous>, transform_indices = @transform_2, window_bounds = array<i64: 1, 50>}, {pipeline_mode = #tpu.pipeline_mode<synchronous>, transform_indices = @transform_3, window_bounds = array<i64: 50, 10>}, {pipeline_mode = #tpu.pipeline_mode<synchronous>, transform_indices = @transform_4, window_bounds = array<i64: 1, 10>}, {pipeline_mode = #tpu.pipeline_mode<synchronous>, transform_indices = @transform_5, window_bounds = array<i64: 1, 10>}, {pipeline_mode = #tpu.pipeline_mode<synchronous>, transform_indices = @transform_6, window_bounds = array<i64: 1, 1>}, {transform_indices = @transform_7, window_bounds = array<i64: 1, 128>}]} {
    %c0 = arith.constant 0 : index
    %c0_0 = arith.constant 0 : index
    %0 = vector.load %arg1[%c0, %c0_0] : memref<128x9xbf16, #tpu.memory_space<vmem>>, vector<128x9xbf16>
    %1 = arith.extf %0 : vector<128x9xbf16> to vector<128x9xf32>
    %c0_1 = arith.constant 0 : index
    %c0_2 = arith.constant 0 : index
    %2 = vector.load %arg2[%c0_1, %c0_2] : memref<9x50xf32, #tpu.memory_space<vmem>>, vector<9x50xf32>
    %cst = arith.constant dense<0.000000e+00> : vector<128x50xf32>
    %3 = tpu.matmul %1, %2, %cst {dimension_numbers = #tpu.dot_dimension_numbers<[1], [0], [0], [1], [0, 0, 1, 1], [], []>} : vector<128x9xf32>, vector<9x50xf32>, vector<128x50xf32> -> vector<128x50xf32>
    %c0_3 = arith.constant 0 : index
    %c0_4 = arith.constant 0 : index
    %4 = vector.load %arg3[%c0_3, %c0_4] : memref<1x50xf32, #tpu.memory_space<vmem>>, vector<1x50xf32>
    %5 = vector.broadcast %4 : vector<1x50xf32> to vector<128x50xf32>
    %6 = arith.addf %3, %5 : vector<128x50xf32>
    %cst_5 = arith.constant 0.000000e+00 : f32
    %7 = vector.broadcast %cst_5 : f32 to vector<128x50xf32>
    %8 = arith.maximumf %6, %7 : vector<128x50xf32>
    %c0_6 = arith.constant 0 : index
    %c0_7 = arith.constant 0 : index
    %9 = vector.load %arg4[%c0_6, %c0_7] : memref<50x10xf32, #tpu.memory_space<vmem>>, vector<50x10xf32>
    %cst_8 = arith.constant dense<0.000000e+00> : vector<128x10xf32>
    %10 = tpu.matmul %8, %9, %cst_8 {dimension_numbers = #tpu.dot_dimension_numbers<[1], [0], [0], [1], [0, 0, 1, 1], [], []>} : vector<128x50xf32>, vector<50x10xf32>, vector<128x10xf32> -> vector<128x10xf32>
    %c0_9 = arith.constant 0 : index
    %c0_10 = arith.constant 0 : index
    %11 = vector.load %arg5[%c0_9, %c0_10] : memref<1x10xf32, #tpu.memory_space<vmem>>, vector<1x10xf32>
    %12 = vector.broadcast %11 : vector<1x10xf32> to vector<128x10xf32>
    %13 = arith.addf %10, %12 : vector<128x10xf32>
    %cst_11 = arith.constant 0.000000e+00 : f32
    %14 = vector.broadcast %cst_11 : f32 to vector<128x10xf32>
    %15 = arith.maximumf %13, %14 : vector<128x10xf32>
    %c0_12 = arith.constant 0 : index
    %c0_13 = arith.constant 0 : index
    %16 = vector.load %arg6[%c0_12, %c0_13] : memref<1x10xf32, #tpu.memory_space<vmem>>, vector<1x10xf32>
    %cst_14 = arith.constant dense<0.000000e+00> : vector<1x128xf32>
    %17 = tpu.matmul %16, %15, %cst_14 {dimension_numbers = #tpu.dot_dimension_numbers<[1], [1], [0], [0], [0, 0, 1, 0], [], []>} : vector<1x10xf32>, vector<128x10xf32>, vector<1x128xf32> -> vector<1x128xf32>
    %c0_15 = arith.constant 0 : index
    %c0_16 = arith.constant 0 : index
    %18 = vector.load %arg7[%c0_15, %c0_16] : memref<1x1xf32, #tpu.memory_space<vmem>>, vector<1x1xf32>
    %19 = vector.broadcast %18 : vector<1x1xf32> to vector<1x128xf32>
    %20 = arith.addf %17, %19 : vector<1x128xf32>
    %cst_17 = arith.constant 0.000000e+00 : f32
    %21 = vector.broadcast %cst_17 : f32 to vector<1x128xf32>
    %22 = arith.maximumf %20, %21 : vector<1x128xf32>
    %23 = math.absf %20 : vector<1x128xf32>
    %cst_18 = arith.constant 0.000000e+00 : f32
    %24 = vector.broadcast %cst_18 : f32 to vector<1x128xf32>
    %25 = arith.subf %24, %23 : vector<1x128xf32>
    %26 = math.exp %25 : vector<1x128xf32>
    %27 = math.log1p %26 : vector<1x128xf32>
    %28 = arith.addf %22, %27 : vector<1x128xf32>
    %c0_19 = arith.constant 0 : index
    %c0_20 = arith.constant 0 : index
    %29 = vector.load %arg8[%c0_19, %c0_20] : memref<1x128xf32, #tpu.memory_space<vmem>>, vector<1x128xf32>
    tpu.vector_store %arg8[%c0_19, %c0_20], %28 {strides = array<i32>} : memref<1x128xf32, #tpu.memory_space<vmem>>, vector<1x128xf32>,
    return
  }
  func.func @transform_0(%arg0: i32) -> (i32, i32) {
    %c0_i32 = arith.constant 0 : i32
    %c0_i32_0 = arith.constant 0 : i32
    return %arg0, %c0_i32 : i32, i32
  }
  func.func @transform_1(%arg0: i32) -> (i32, i32) {
    %c0_i32 = arith.constant 0 : i32
    %c0_i32_0 = arith.constant 0 : i32
    %c0_i32_1 = arith.constant 0 : i32
    return %c0_i32, %c0_i32_0 : i32, i32
  }
  func.func @transform_2(%arg0: i32) -> (i32, i32) {
    %c0_i32 = arith.constant 0 : i32
    %c0_i32_0 = arith.constant 0 : i32
    %c0_i32_1 = arith.constant 0 : i32
    return %c0_i32, %c0_i32_0 : i32, i32
  }
  func.func @transform_3(%arg0: i32) -> (i32, i32) {
    %c0_i32 = arith.constant 0 : i32
    %c0_i32_0 = arith.constant 0 : i32
    %c0_i32_1 = arith.constant 0 : i32
    return %c0_i32, %c0_i32_0 : i32, i32
  }
  func.func @transform_4(%arg0: i32) -> (i32, i32) {
    %c0_i32 = arith.constant 0 : i32
    %c0_i32_0 = arith.constant 0 : i32
    %c0_i32_1 = arith.constant 0 : i32
    return %c0_i32, %c0_i32_0 : i32, i32
  }
  func.func @transform_5(%arg0: i32) -> (i32, i32) {
    %c0_i32 = arith.constant 0 : i32
    %c0_i32_0 = arith.constant 0 : i32
    %c0_i32_1 = arith.constant 0 : i32
    return %c0_i32, %c0_i32_0 : i32, i32
  }
  func.func @transform_6(%arg0: i32) -> (i32, i32) {
    %c0_i32 = arith.constant 0 : i32
    %c0_i32_0 = arith.constant 0 : i32
    %c0_i32_1 = arith.constant 0 : i32
    return %c0_i32, %c0_i32_0 : i32, i32
  }
  func.func @transform_7(%arg0: i32) -> (i32, i32) {
    %c0_i32 = arith.constant 0 : i32
    %c0_i32_0 = arith.constant 0 : i32
    return %c0_i32, %arg0 : i32, i32
  }
}

</mosaic_0001>

<bundles_post_ra>
// kernel: net_forward.1
= control target key start
LH: loop header
LB: loop body
LE: loop exit
PB: predicated region body
PF: predicated region fallthrough
CT: control target
= control target key end

     0   :  { %vm118_vm0 = vcmask 1040384   ;;  %vm975_vm1 = vmmov 1   ;;  %vm69_vm3 = vcmask 72704   ;;  %vm346_vm4 = vcmask 1041408   ;;  %s1149_s1 = inlined_call_operand.vmem [shape: f32[9,50], index: 1, kind: input, shape index: {}]   ;;  %s1150_s0 = inlined_call_operand.vmem [shape: bf16[128,9], index: 0, kind: input, shape index: {}]   ;;  %s1151_s3 = inlined_call_operand.vmem [shape: f32[50,10], index: 3, kind: input, shape index: {}]   ;;  %s1152_s2 = inlined_call_operand.vmem [shape: f32[1,50], index: 2, kind: input, shape index: {}]   ;;  %s1153_s6 = inlined_call_operand.<no memory space> [shape: f32[1,1], index: 6, kind: input, shape index: {}]   ;;  %s1154_s4 = inlined_call_operand.vmem [shape: f32[1,10], index: 4, kind: input, shape index: {}]   ;;  %s1155_s5 = inlined_call_operand.vmem [shape: f32[1,10], index: 5, kind: input, shape index: {}]   ;;  %s1156_s7 = inlined_call_operand.vmem [shape: f32[1,128], index: 7, kind: output, shape index: {}]  }
   0x1   :  { %v60_v0 = vld [vmem:[%s1149_s1] sm:$0xff]  ;;  %v61_v1 = vld [vmem:[%s1149_s1 + $0x8] sm:$0x1]  ;;  %vm916_vm2 = vmpackc.low %vm118_vm0, %vm975_vm1  ;;  %vm297_vm5 = vcmask 408576   ;;  %vm977_vm6 = vmmov 0   ;;  %vm522_vm7 = vcmask 80896  }
   0x2   :  { %v915_v2 = vpack.c.bf16 %v61_v1, %v60_v0  ;;  %v718_v3 = vld [vmem:[%s1150_s0] sm:$0xff]   ;;  %v749_v4 = vld [vmem:[%s1150_s0 + $0x8] sm:$0xff]   ;;  %v285_v10 = vld [vmem:[%s1151_s3 + $0x10] sm:$0xff] }
   0x3   :  { %v719_v5 = vunpack.c.l.bf16 %v718_v3  ;;  %v720_v6 = vunpack.c.h.bf16 %v718_v3  ;;  %v283_v7 = vld [vmem:[%s1151_s3] sm:$0xff]  ;;  %v723_v8 = vunpack.c.l.bf16 %v749_v4  ;;  %v284_v9 = vld [vmem:[%s1151_s3 + $0x8] sm:$0xff]  ;;  %v286_v11 = vld [vmem:[%s1151_s3 + $0x18] sm:$0xff]  ;;  %v724_v15 = vunpack.c.h.bf16 %v749_v4 }
   0x4   :  { %917 = vmatprep.subr.msk.bf16.mxu1 %vm916_vm2, %v915_v2  ;;  %v750_v12 = vld [vmem:[%s1150_s0 + $0x10] sm:$0xff]   ;;  %v921_v13 = vpack.c.bf16 %v284_v9, %v283_v7  ;;  %v925_v14 = vpack.c.bf16 %v286_v11, %v285_v10  ;;  %v287_v16 = vld [vmem:[%s1151_s3 + $0x20] sm:$0xff]  ;;  %v288_v17 = vld [vmem:[%s1151_s3 + $0x28] sm:$0xff] }
   0x5   :  { %920 = vmatpush3.bf16.msk.msra.mxu1 %vm916_vm2, %v915_v2  ;;  %818 = vmatprep.mubr.msk.f32.mxu1 %vm69_vm3, %v719_v5  ;;  %v727_v18 = vunpack.c.l.bf16 %v750_v12  ;;  %v751_v19 = vld [vmem:[%s1150_s0 + $0x18] sm:$0xff]   ;;  %v929_v20 = vpack.c.bf16 %v288_v17, %v287_v16  ;;  %v728_v21 = vunpack.c.h.bf16 %v750_v12  ;;  %v752_v23 = vld [vmem:[%s1150_s0 + $0x20] sm:$0xff]   ;;  %v289_v25 = vld [vmem:[%s1151_s3 + $0x30] sm:$0x3] }
   0x6   :  { %922 = vmatprep.subr.bf16.mxu1 %v921_v13  ;;  %v731_v22 = vunpack.c.l.bf16 %v751_v19  ;;  %v732_v24 = vunpack.c.h.bf16 %v751_v19  ;;  %v735_v26 = vunpack.c.l.bf16 %v752_v23  ;;  %v753_v27 = vld [vmem:[%s1150_s0 + $0x28] sm:$0xff]   ;;  %v736_v28 = vunpack.c.h.bf16 %v752_v23  ;;  %v754_v30 = vld [vmem:[%s1150_s0 + $0x30] sm:$0xff]   ;;  %v755_v33 = vld [vmem:[%s1150_s0 + $0x38] sm:$0xff]  }
   0x7   :  { %v739_v29 = vunpack.c.l.bf16 %v753_v27  ;;  %v740_v31 = vunpack.c.h.bf16 %v753_v27  ;;  %v743_v32 = vunpack.c.l.bf16 %v754_v30  ;;  %v744_v34 = vunpack.c.h.bf16 %v754_v30  ;;  %v664_v37 = vld [vmem:[%s1152_s2] ss:$0 sm:$0xff]  ;;  %vm1115_vm8 = vmpackc.low %vm522_vm7, %vm522_vm7 }
   0x8   :  { %819 = vmatmul.mubr.msk.f32.vlgmr.msra.gmra.mrb[0].mxu1 %vm69_vm3, %v720_v6  ;;  %v747_v35 = vunpack.c.l.bf16 %v755_v33  ;;  %v748_v36 = vunpack.c.h.bf16 %v755_v33  ;;  %v978_v23 = vmov 0.0   ;;  %v682_v27 = vld [vmem:[%s1154_s4] ss:$0 sm:$0xff] }
   0x9   :  { %821 = vmatprep.mubr.msk.f32.mxu1 %vm69_vm3, %v723_v8  ;;  %924 = vmatpush3.bf16.msra.mxu1 %v921_v13 }
   0xa   :  { %926 = vmatprep.subr.bf16.mxu1 %v925_v14  ;;  %912 = vmatprep.mubr.msk.f32.mxu0 %vm977_vm6, %v978_v23  ;;  %v518_v23 = vlaneseq }
   0xc   :  { %822 = vmatmul.mubr.msk.f32.gmra.mrb[2].mxu1 %vm69_vm3, %v724_v15 }
   0xd   :  { %824 = vmatprep.mubr.msk.f32.mxu1 %vm69_vm3, %v727_v18  ;;  %928 = vmatpush3.bf16.msra.mxu1 %v925_v14 }
   0xe   :  { %930 = vmatprep.subr.bf16.mxu1 %v929_v20 }
  0x10   :  { %825 = vmatmul.mubr.msk.f32.gmra.mrb[4].mxu1 %vm69_vm3, %v728_v21 }
  0x11   :  { %827 = vmatprep.mubr.msk.f32.mxu1 %vm69_vm3, %v731_v22  ;;  %932 = vmatpush3.bf16.msra.mxu1 %v929_v20  ;;  %v976_v22 = vmov 0.0|0.0  }
  0x12   :  { %854 = vmatprep.subr.msk.mxu1 %vm346_vm4, %v289_v25  ;;  %933 = vmatprep.subr.bf16.mxu0 %v976_v22 }
  0x14   :  { %828 = vmatmul.mubr.msk.f32.gmra.mrb[6].mxu1 %vm69_vm3, %v732_v24  ;;  %v979_v24 = vmov 0  }
  0x15   :  { %830 = vmatprep.mubr.msk.f32.mxu1 %vm69_vm3, %v735_v26  ;;  %855 = vmatpush3.msk.msra.mxu1 %vm346_vm4, %v289_v25  ;;  %v12_v25 = vstv %s1153_s6 }
  0x16   :  { %970 = vset.pattern.permute.xlu0 %v979_v24  ;;  %13 = vst [vmem:[#allocation2] sm:$0x1] %v12_v25  ;;  %v519_v24 = vshrl.u32 %v518_v23, 7 }
  0x18   :  { %831 = vmatmul.mubr.msk.f32.gmra.mrb[8].mxu1 %vm69_vm3, %v736_v28  ;;  %v520_v25 = vsub.s32 0, %v519_v24 }
  0x19   :  { %833 = vmatprep.mubr.msk.f32.mxu1 %vm69_vm3, %v739_v29 }
  0x1c   :  { %834 = vmatmul.mubr.msk.f32.gmra.mrb[10].mxu1 %vm69_vm3, %v740_v31 }
  0x1d   :  { %836 = vmatprep.mubr.msk.f32.mxu1 %vm69_vm3, %v743_v32  ;;  %v512_v26 = vld [vmem:[#allocation2] sm:$0x1] }
  0x1e   :  { %515 = vperm.xlu0 %970, %v512_v26  }
  0x20   :  { %837 = vmatmul.mubr.msk.f32.gmra.mrb[12].mxu1 %vm69_vm3, %v744_v34 }
  0x21   :  { %839 = vmatprep.mubr.msk.f32.mxu1 %vm69_vm3, %v747_v35 }
  0x24   :  { %840 = vmatmul.mubr.msk.f32.gmra.mrb[14].mxu1 %vm69_vm3, %v748_v36 }
  0x9d   :  { %v516_v26 = vpop.permute.xlu0 %515 }
  0xdb   :  { %v820_v38 = vpop.f32.mrb[0].mxu1 }
  0xdc   :  { %v194_v39 = vadd.f32 %v820_v38, %v664_v37  ;;  %v188_v40 = vpop.f32.mrb[1].mxu1 }
  0xdd   :  { %v189_v41 = vadd.f32 %v664_v37, %v188_v40 }
  0xde   :  { %v268_v44 = vmax.f32 %v194_v39, 0.0 }
  0xdf   :  { %v267_v42 = vmax.f32 %v189_v41, 0.0  ;;  %v823_v43 = vpop.f32.mrb[2].mxu1 }
  0xe0   :  { %v204_v45 = vadd.f32 %v823_v43, %v664_v37  ;;  %v198_v46 = vpop.f32.mrb[3].mxu1 }
  0xe1   :  { %v199_v47 = vadd.f32 %v664_v37, %v198_v46  ;;  %856 = vmatprep.mubr.msk.f32.mxu1 %vm297_vm5, %v267_v42 }
  0xe2   :  { %v270_v48 = vmax.f32 %v204_v45, 0.0  ;;  %857 = vmatmul.mubr.msk.f32.vlgmr.msra.gmra.mrb[16].mxu1 %vm297_vm5, %v268_v44 }
  0xe3   :  { %v269_v49 = vmax.f32 %v199_v47, 0.0  ;;  %v826_v50 = vpop.f32.mrb[4].mxu1 }
  0xe4   :  { %v214_v51 = vadd.f32 %v826_v50, %v664_v37  ;;  %v208_v52 = vpop.f32.mrb[5].mxu1 }
  0xe5   :  { %859 = vmatprep.mubr.msk.f32.mxu1 %vm297_vm5, %v269_v49  ;;  %v209_v53 = vadd.f32 %v664_v37, %v208_v52 }
  0xe6   :  { %860 = vmatmul.mubr.msk.f32.gmra.mrb[18].mxu1 %vm297_vm5, %v270_v48  ;;  %v272_v54 = vmax.f32 %v214_v51, 0.0 }
  0xe7   :  { %v271_v55 = vmax.f32 %v209_v53, 0.0  ;;  %v829_v56 = vpop.f32.mrb[6].mxu1 }
  0xe8   :  { %v224_v57 = vadd.f32 %v829_v56, %v664_v37  ;;  %v218_v58 = vpop.f32.mrb[7].mxu1 }
  0xe9   :  { %862 = vmatprep.mubr.msk.f32.mxu1 %vm297_vm5, %v271_v55  ;;  %v219_v59 = vadd.f32 %v664_v37, %v218_v58 }
  0xea   :  { %863 = vmatmul.mubr.msk.f32.gmra.mrb[20].mxu1 %vm297_vm5, %v272_v54  ;;  %v274_v60 = vmax.f32 %v224_v57, 0.0 }
  0xeb   :  { %v273_v61 = vmax.f32 %v219_v59, 0.0  ;;  %v832_v62 = vpop.f32.mrb[8].mxu1 }
  0xec   :  { %v234_v63 = vadd.f32 %v832_v62, %v664_v37  ;;  %v228_v0 = vpop.f32.mrb[9].mxu1 }
  0xed   :  { %865 = vmatprep.mubr.msk.f32.mxu1 %vm297_vm5, %v273_v61  ;;  %v229_v1 = vadd.f32 %v664_v37, %v228_v0 }
  0xee   :  { %866 = vmatmul.mubr.msk.f32.gmra.mrb[22].mxu1 %vm297_vm5, %v274_v60  ;;  %v276_v2 = vmax.f32 %v234_v63, 0.0 }
  0xef   :  { %v275_v3 = vmax.f32 %v229_v1, 0.0  ;;  %v835_v4 = vpop.f32.mrb[10].mxu1 }
  0xf0   :  { %v244_v5 = vadd.f32 %v835_v4, %v664_v37  ;;  %v238_v6 = vpop.f32.mrb[11].mxu1 }
  0xf1   :  { %868 = vmatprep.mubr.msk.f32.mxu1 %vm297_vm5, %v275_v3  ;;  %v239_v7 = vadd.f32 %v664_v37, %v238_v6 }
  0xf2   :  { %869 = vmatmul.mubr.msk.f32.gmra.mrb[24].mxu1 %vm297_vm5, %v276_v2  ;;  %v278_v8 = vmax.f32 %v244_v5, 0.0 }
  0xf3   :  { %v277_v9 = vmax.f32 %v239_v7, 0.0  ;;  %v838_v10 = vpop.f32.mrb[12].mxu1 }
  0xf4   :  { %v254_v11 = vadd.f32 %v838_v10, %v664_v37  ;;  %v248_v12 = vpop.f32.mrb[13].mxu1 }
  0xf5   :  { %871 = vmatprep.mubr.msk.f32.mxu1 %vm297_vm5, %v277_v9  ;;  %v249_v13 = vadd.f32 %v664_v37, %v248_v12 }
  0xf6   :  { %872 = vmatmul.mubr.msk.f32.gmra.mrb[26].mxu1 %vm297_vm5, %v278_v8  ;;  %v280_v14 = vmax.f32 %v254_v11, 0.0 }
  0xf7   :  { %v279_v15 = vmax.f32 %v249_v13, 0.0  ;;  %v841_v16 = vpop.f32.mrb[14].mxu1 }
  0xf8   :  { %v264_v17 = vadd.f32 %v841_v16, %v664_v37  ;;  %v258_v18 = vpop.f32.mrb[15].mxu1 }
  0xf9   :  { %874 = vmatprep.mubr.msk.f32.mxu1 %vm297_vm5, %v279_v15  ;;  %v259_v19 = vadd.f32 %v664_v37, %v258_v18 }
  0xfa   :  { %875 = vmatmul.mubr.msk.f32.gmra.mrb[28].mxu1 %vm297_vm5, %v280_v14  ;;  %v282_v20 = vmax.f32 %v264_v17, 0.0 }
  0xfb   :  { %v281_v21 = vmax.f32 %v259_v19, 0.0 }
  0xfd   :  { %877 = vmatprep.mubr.msk.f32.mxu1 %vm297_vm5, %v281_v21  ;;  %v511_v21 = vld [vmem:[%s1155_s5] sm:$0x1] }
  0xfe   :  { %878 = vmatmul.mubr.msk.f32.gmra.mrb[30].mxu1 %vm297_vm5, %v282_v20 }
 0x1b5   :  { %v858_v28 = vpop.f32.mrb[16].mxu1 }
 0x1b6   :  { %v422_v29 = vadd.f32 %v858_v28, %v682_v27  ;;  %v416_v30 = vpop.f32.mrb[17].mxu1 }
 0x1b7   :  { %v417_v31 = vadd.f32 %v682_v27, %v416_v30 }
 0x1b8   :  { %v496_v32 = vmax.f32 %v422_v29, 0.0 }
 0x1b9   :  { %v495_v33 = vmax.f32 %v417_v31, 0.0  ;;  %v861_v34 = vpop.f32.mrb[18].mxu1 }
 0x1ba   :  { %v432_v35 = vadd.f32 %v861_v34, %v682_v27  ;;  %v426_v36 = vpop.f32.mrb[19].mxu1 }
 0x1bb   :  { %v934_v38 = vpack.c.bf16 %v496_v32, %v495_v33  ;;  %v427_v39 = vadd.f32 %v682_v27, %v426_v36 }
 0x1bc   :  { %v498_v40 = vmax.f32 %v432_v35, 0.0 }
 0x1bd   :  { %v497_v41 = vmax.f32 %v427_v39, 0.0  ;;  %936 = vmatpush3.bf16.xpose.msk.msra.mxu0 %vm1115_vm8, %v934_v38  ;;  %v864_v42 = vpop.f32.mrb[20].mxu1 }
 0x1be   :  { %v442_v43 = vadd.f32 %v864_v42, %v682_v27  ;;  %v436_v44 = vpop.f32.mrb[21].mxu1  ;;  %937 = vmatprep.subr.bf16.mxu0 %v976_v22 }
 0x1bf   :  { %v938_v45 = vpack.c.bf16 %v498_v40, %v497_v41  ;;  %v437_v46 = vadd.f32 %v682_v27, %v436_v44 }
 0x1c0   :  { %v500_v47 = vmax.f32 %v442_v43, 0.0 }
 0x1c1   :  { %v499_v48 = vmax.f32 %v437_v46, 0.0  ;;  %v867_v49 = vpop.f32.mrb[22].mxu1 }
 0x1c2   :  { %v452_v50 = vadd.f32 %v867_v49, %v682_v27  ;;  %v446_v51 = vpop.f32.mrb[23].mxu1 }
 0x1c3   :  { %v942_v52 = vpack.c.bf16 %v500_v47, %v499_v48  ;;  %v447_v53 = vadd.f32 %v682_v27, %v446_v51 }
 0x1c4   :  { %v502_v54 = vmax.f32 %v452_v50, 0.0 }
 0x1c5   :  { %940 = vmatpush3.bf16.xpose.msk.msra.mxu0 %vm1115_vm8, %v938_v45  ;;  %v501_v55 = vmax.f32 %v447_v53, 0.0  ;;  %v870_v56 = vpop.f32.mrb[24].mxu1 }
 0x1c6   :  { %941 = vmatprep.subr.bf16.mxu0 %v976_v22  ;;  %v462_v57 = vadd.f32 %v870_v56, %v682_v27  ;;  %v456_v58 = vpop.f32.mrb[25].mxu1 }
 0x1c7   :  { %v946_v59 = vpack.c.bf16 %v502_v54, %v501_v55  ;;  %v457_v60 = vadd.f32 %v682_v27, %v456_v58 }
 0x1c8   :  { %v504_v61 = vmax.f32 %v462_v57, 0.0 }
 0x1c9   :  { %v503_v62 = vmax.f32 %v457_v60, 0.0  ;;  %v873_v63 = vpop.f32.mrb[26].mxu1 }
 0x1ca   :  { %v472_v0 = vadd.f32 %v873_v63, %v682_v27  ;;  %v466_v1 = vpop.f32.mrb[27].mxu1 }
 0x1cb   :  { %v950_v2 = vpack.c.bf16 %v504_v61, %v503_v62  ;;  %v467_v3 = vadd.f32 %v682_v27, %v466_v1 }
 0x1cc   :  { %v506_v4 = vmax.f32 %v472_v0, 0.0 }
 0x1cd   :  { %944 = vmatpush3.bf16.xpose.msk.msra.mxu0 %vm1115_vm8, %v942_v52  ;;  %v505_v5 = vmax.f32 %v467_v3, 0.0  ;;  %v876_v6 = vpop.f32.mrb[28].mxu1 }
 0x1ce   :  { %945 = vmatprep.subr.bf16.mxu0 %v976_v22  ;;  %v482_v7 = vadd.f32 %v876_v6, %v682_v27  ;;  %v476_v8 = vpop.f32.mrb[29].mxu1 }
 0x1cf   :  { %v954_v9 = vpack.c.bf16 %v506_v4, %v505_v5  ;;  %v477_v10 = vadd.f32 %v682_v27, %v476_v8 }
 0x1d0   :  { %v508_v11 = vmax.f32 %v482_v7, 0.0 }
 0x1d1   :  { %v507_v12 = vmax.f32 %v477_v10, 0.0  ;;  %v879_v13 = vpop.f32.mrb[30].mxu1 }
 0x1d2   :  { %v492_v14 = vadd.f32 %v879_v13, %v682_v27  ;;  %v486_v15 = vpop.f32.mrb[31].mxu1 }
 0x1d3   :  { %v958_v16 = vpack.c.bf16 %v508_v11, %v507_v12  ;;  %v487_v17 = vadd.f32 %v682_v27, %v486_v15  ;;  %v521_v27 = vrot.slane %v516_v26, %v520_v25 }
 0x1d4   :  { %v510_v18 = vmax.f32 %v492_v14, 0.0 }
 0x1d5   :  { %948 = vmatpush3.bf16.xpose.msk.msra.mxu0 %vm1115_vm8, %v946_v59  ;;  %v509_v19 = vmax.f32 %v487_v17, 0.0 }
 0x1d6   :  { %949 = vmatprep.subr.bf16.mxu0 %v976_v22 }
 0x1d7   :  { %v962_v20 = vpack.c.bf16 %v510_v18, %v509_v19 }
 0x1dd   :  { %952 = vmatpush3.bf16.xpose.msk.msra.mxu0 %vm1115_vm8, %v950_v2 }
 0x1de   :  { %953 = vmatprep.subr.bf16.mxu0 %v976_v22 }
 0x1e5   :  { %956 = vmatpush3.bf16.xpose.msk.msra.mxu0 %vm1115_vm8, %v954_v9 }
 0x1e6   :  { %957 = vmatprep.subr.bf16.mxu0 %v976_v22 }
 0x1ed   :  { %960 = vmatpush3.bf16.xpose.msk.msra.mxu0 %vm1115_vm8, %v958_v16 }
 0x1ee   :  { %961 = vmatprep.subr.bf16.mxu0 %v976_v22 }
 0x1f5   :  { %964 = vmatpush3.bf16.xpose.msk.msra.mxu0 %vm1115_vm8, %v962_v20 }
 0x1fc   :  { %913 = vmatmul.mubr.msk.f32.vlgmr.msra.gmra.mrb[0].mxu0 %vm522_vm7, %v511_v21 }
 0x2cf   :  { %v640_v28 = vpop.f32.mrb[0].mxu0 }
 0x2d0   :  { %v641_v29 = vadd.f32 %v640_v28, %v521_v27  ;;  %v914_v30 = vpop.f32.mrb[1].mxu0 }
 0x2d2   :  { %v645_v31 = vand.u32 2147483647, %v641_v29  ;;  %v644_v41 = vmax.f32 %v641_v29, 0.0 }
 0x2d4   :  { %v646_v32 = vsub.f32 0.0, %v645_v31 }
 0x2d6   :  { %v647_v22 = vmul.f32 1.442695, %v646_v32 }
 0x2d8   :  { %971 = vpow2.f32 %v647_v22 }
 0x2e2   :  { %v972_v33 = vpop.eup %971 }
 0x2e3   :  { %v649_v34 = vadd.f32 1.0, %v972_v33  ;;  %v652_v35 = vmul.f32 -0.5, %v972_v33  ;;  %v655_v37 = vand.u32 2147483647, %v972_v33 }
 0x2e5   :  { %973 = vlog2.f32 %v649_v34  ;;  %v653_v36 = vadd.f32 1.0, %v652_v35  ;;  %vm656_vm9 = vcmp.lt.f32.partialorder %v655_v37, 0.0004427343 }
 0x2e7   :  { %v654_v40 = vmul.f32 %v972_v33, %v653_v36 }
 0x2ef   :  { %v974_v38 = vpop.eup %973 }
 0x2f0   :  { %v651_v39 = vmul.f32 0.6931472, %v974_v38 }
 0x2f2   :  { %v657_v42 = vsel %vm656_vm9, %v654_v40, %v651_v39 }
 0x2f3   :  { %v658_v43 = vadd.f32 %v657_v42, %v644_v41 }
 0x2f5   :  { %659 = vst [vmem:[%s1156_s7] sm:$0x1] %v658_v43 }

</bundles_post_ra>
